<compile_context>
chip_gen: v7x
topology: tpu7x:2x2x1
jax: 0.10.0
libtpu: 0.0.40
codegen_flags: <defaults>
</compile_context>

<pallas_src>
import jax
import jax.numpy as jnp
from jax.experimental import pallas as pl
from jax.experimental.pallas import tpu as pltpu

C_AIR = 1.0012


def convert_F_to_K(T_F):
    return (T_F - 32.0) * 5.0 / 9.0 + 273.15


def _round_up(x, m):
    return ((x + m - 1) // m) * m


def _residual_kernel(params_ref, t_hc_ref, t_r_ref, dT_ref, out_ref):
    # params_ref (SMEM, scalar-prefetched, shape (5,)):
    #   [Cap, UA_amb, UA_2c, T_amb, T_2c]
    cap = params_ref[0]
    ua_amb = params_ref[1]
    ua_2c = params_ref[2]
    t_amb = params_ref[3]
    t_2c = params_ref[4]

    t_hc = t_hc_ref[...]
    t_r = t_r_ref[...]
    dT = dT_ref[...]

    # Same association order as the PyTorch forward (no algebraic folding, so
    # no catastrophic cancellation of the small residual).
    out_ref[...] = (
        cap * dT
        - jnp.float32(C_AIR) * (t_hc - t_r)
        - ua_amb * (t_r - t_amb)
        - ua_2c * (t_2c - t_r)
    )


def parameter_estimator_forward(
    Cap, UA_amb, UA_2c, T_amb, T_2c, T_hc, T_r, dT_r_dt,
    *, lanes=512, max_tile_rows=512,
):
    """Cap/UA_amb/UA_2c/T_amb/T_2c: f32 scalars; T_hc/T_r/dT_r_dt: (N,) f32."""
    N = T_hc.shape[0]

    params = jnp.stack([
        jnp.asarray(Cap, jnp.float32),
        jnp.asarray(UA_amb, jnp.float32),
        jnp.asarray(UA_2c, jnp.float32),
        jnp.asarray(T_amb, jnp.float32),
        jnp.asarray(T_2c, jnp.float32),
    ])

    # ---- layout: (N,) -> (rows, lanes); pad only to the next 8-row boundary ----
    rows = _round_up(pl.cdiv(N, lanes), 8)      # adds at most 8*lanes-1 elements
    padded_N = rows * lanes

    # tile_rows: multiple of 8 (guard against caller-supplied values), <= rows,
    # and small enough that the grid keeps >= 4 steps when the series is long
    # enough (v7x megacore split + pipeline overlap).  Pallas masks the final
    # partial block when tile_rows does not divide rows.
    max_tile_rows = max(8, (int(max_tile_rows) // 8) * 8)
    tile_rows = min(max_tile_rows, _round_up(pl.cdiv(rows, 4), 8), rows)
    grid_r = pl.cdiv(rows, tile_rows)

    def to_2d(x):
        x = jnp.asarray(x, jnp.float32)
        x = jnp.pad(x, (0, padded_N - N))
        return x.reshape(rows, lanes)

    block = pl.BlockSpec((tile_rows, lanes), lambda i, p: (i, 0))

    # 3 inputs + 1 output, double-buffered.  Raise the scoped-VMEM limit only
    # when a caller-requested tile would exceed the v5e 16 MiB default.
    footprint = 4 * 2 * tile_rows * lanes * 4
    vmem_limit = None
    if footprint > 12 * 1024 * 1024:
        vmem_limit = min(2 * footprint, 100 * 1024 * 1024)

    out2 = pl.pallas_call(
        _residual_kernel,
        out_shape=jax.ShapeDtypeStruct((rows, lanes), jnp.float32),
        grid_spec=pltpu.PrefetchScalarGridSpec(
            num_scalar_prefetch=1,                # params -> SMEM
            grid=(grid_r,),
            in_specs=[block, block, block],       # T_hc, T_r, dT_r_dt
            out_specs=pl.BlockSpec((tile_rows, lanes), lambda i, p: (i, 0)),
        ),
        compiler_params=pltpu.CompilerParams(
            dimension_semantics=("parallel",),    # independent tiles; v7x: both TCs
            allow_input_fusion=[False, True, True, True],  # fuse pad/reshape into operands
            vmem_limit_bytes=vmem_limit,
        ),
        cost_estimate=pl.CostEstimate(
            flops=10 * padded_N,
            transcendentals=0,
            bytes_accessed=4 * 4 * padded_N,      # 3 reads + 1 write, f32
        ),
    )(params, to_2d(T_hc), to_2d(T_r), to_2d(dT_r_dt))

    return out2.reshape(padded_N)[:N]


if __name__ == "__main__":
    key = jax.random.PRNGKey(0)
    k1, k2, k3 = jax.random.split(key, 3)

    # Deliberately NOT a multiple of 512 so the masked boundary block and a
    # multi-step grid are both exercised.
    N = 131849

    # Deterministic synthetic inputs in Fahrenheit, converted to Kelvin
    # (mirrors the script-level preprocessing in the PyTorch file).
    T_hc_F = 90.0 + 10.0 * jax.random.uniform(k1, (N,), dtype=jnp.float32)
    T_r_F = 70.0 + 5.0 * jax.random.uniform(k2, (N,), dtype=jnp.float32)
    dT_r_dt = 0.1 * jax.random.normal(k3, (N,), dtype=jnp.float32)

    T_hc = convert_F_to_K(T_hc_F)
    T_r = convert_F_to_K(T_r_F)

    # Script-level scalar constants (deterministic).
    T_2c = convert_F_to_K(jnp.float32(55.0))
    T_amb = convert_F_to_K(jnp.float32(75.0))

    # nn.Parameter initializations from __init__: all 1.0
    Cap = jnp.float32(1.0)
    UA_amb = jnp.float32(1.0)
    UA_2c = jnp.float32(1.0)

    residual = parameter_estimator_forward(
        Cap, UA_amb, UA_2c, T_amb, T_2c, T_hc, T_r, dT_r_dt
    )
    residual = jax.block_until_ready(residual)

    assert residual.shape == (N,)
    assert residual.dtype == jnp.float32

    # Reference: the original PyTorch forward expression, identical op order
    # (unfolded), so a tight tolerance holds.
    ref = (
        Cap * dT_r_dt
        - jnp.float32(C_AIR) * (T_hc - T_r)
        - UA_amb * (T_r - T_amb)
        - UA_2c * (T_2c - T_r)
    )
    assert jnp.allclose(residual, ref, rtol=1e-5, atol=1e-4), (
        "max abs err = %g" % float(jnp.max(jnp.abs(residual - ref)))
    )

    print("KERNEL_OK")
</pallas_src>

<mosaic_0001>
module attributes {stable_mosaic.version = 11 : i64} {
  func.func @_residual_kernel(%arg0: i32, %arg1: memref<5xf32, #tpu.memory_space<smem>>, %arg2: memref<72x512xf32, #tpu.memory_space<vmem>>, %arg3: memref<72x512xf32, #tpu.memory_space<vmem>>, %arg4: memref<72x512xf32, #tpu.memory_space<vmem>>, %arg5: memref<72x512xf32, #tpu.memory_space<vmem>>) attributes {dimension_semantics = [#tpu.dimension_semantics<parallel>], iteration_bounds = array<i64: 4>, scalar_prefetch = 1 : i64, scratch_operands = 0 : i64, tpu.core_type = #tpu.core_type<tc>, window_params = [{transform_indices = @transform_0, window_bounds = array<i64: 72, 512>}, {transform_indices = @transform_1, window_bounds = array<i64: 72, 512>}, {transform_indices = @transform_2, window_bounds = array<i64: 72, 512>}, {transform_indices = @transform_3, window_bounds = array<i64: 72, 512>}]} {
    %c0 = arith.constant 0 : index
    %0 = memref.load %arg1[%c0] : memref<5xf32, #tpu.memory_space<smem>>
    %c1 = arith.constant 1 : index
    %1 = memref.load %arg1[%c1] : memref<5xf32, #tpu.memory_space<smem>>
    %c2 = arith.constant 2 : index
    %2 = memref.load %arg1[%c2] : memref<5xf32, #tpu.memory_space<smem>>
    %c3 = arith.constant 3 : index
    %3 = memref.load %arg1[%c3] : memref<5xf32, #tpu.memory_space<smem>>
    %c4 = arith.constant 4 : index
    %4 = memref.load %arg1[%c4] : memref<5xf32, #tpu.memory_space<smem>>
    %c0_0 = arith.constant 0 : index
    %c0_1 = arith.constant 0 : index
    %5 = vector.load %arg2[%c0_0, %c0_1] : memref<72x512xf32, #tpu.memory_space<vmem>>, vector<72x512xf32>
    %c0_2 = arith.constant 0 : index
    %c0_3 = arith.constant 0 : index
    %6 = vector.load %arg3[%c0_2, %c0_3] : memref<72x512xf32, #tpu.memory_space<vmem>>, vector<72x512xf32>
    %c0_4 = arith.constant 0 : index
    %c0_5 = arith.constant 0 : index
    %7 = vector.load %arg4[%c0_4, %c0_5] : memref<72x512xf32, #tpu.memory_space<vmem>>, vector<72x512xf32>
    %8 = vector.broadcast %0 : f32 to vector<72x512xf32>
    %9 = arith.mulf %8, %7 : vector<72x512xf32>
    %10 = arith.subf %5, %6 : vector<72x512xf32>
    %cst = arith.constant 1.001200e+00 : f32
    %11 = vector.broadcast %cst : f32 to vector<72x512xf32>
    %12 = arith.mulf %11, %10 : vector<72x512xf32>
    %13 = arith.subf %9, %12 : vector<72x512xf32>
    %14 = vector.broadcast %3 : f32 to vector<72x512xf32>
    %15 = arith.subf %6, %14 : vector<72x512xf32>
    %16 = vector.broadcast %1 : f32 to vector<72x512xf32>
    %17 = arith.mulf %16, %15 : vector<72x512xf32>
    %18 = arith.subf %13, %17 : vector<72x512xf32>
    %19 = vector.broadcast %4 : f32 to vector<72x512xf32>
    %20 = arith.subf %19, %6 : vector<72x512xf32>
    %21 = vector.broadcast %2 : f32 to vector<72x512xf32>
    %22 = arith.mulf %21, %20 : vector<72x512xf32>
    %23 = arith.subf %18, %22 : vector<72x512xf32>
    %c0_6 = arith.constant 0 : index
    %c0_7 = arith.constant 0 : index
    %24 = vector.load %arg5[%c0_6, %c0_7] : memref<72x512xf32, #tpu.memory_space<vmem>>, vector<72x512xf32>
    tpu.vector_store %arg5[%c0_6, %c0_7], %23 {strides = array<i32>} : memref<72x512xf32, #tpu.memory_space<vmem>>, vector<72x512xf32>,
    return
  }
  func.func @transform_0(%arg0: i32, %arg1: memref<5xf32, #tpu.memory_space<smem>>) -> (i32, i32) {
    %c0_i32 = arith.constant 0 : i32
    %c0_i32_0 = arith.constant 0 : i32
    return %arg0, %c0_i32 : i32, i32
  }
  func.func @transform_1(%arg0: i32, %arg1: memref<5xf32, #tpu.memory_space<smem>>) -> (i32, i32) {
    %c0_i32 = arith.constant 0 : i32
    %c0_i32_0 = arith.constant 0 : i32
    return %arg0, %c0_i32 : i32, i32
  }
  func.func @transform_2(%arg0: i32, %arg1: memref<5xf32, #tpu.memory_space<smem>>) -> (i32, i32) {
    %c0_i32 = arith.constant 0 : i32
    %c0_i32_0 = arith.constant 0 : i32
    return %arg0, %c0_i32 : i32, i32
  }
  func.func @transform_3(%arg0: i32, %arg1: memref<5xf32, #tpu.memory_space<smem>>) -> (i32, i32) {
    %c0_i32 = arith.constant 0 : i32
    %c0_i32_0 = arith.constant 0 : i32
    return %arg0, %c0_i32 : i32, i32
  }
}

</mosaic_0001>

<bundles_post_ra>
// kernel: tpu_custom_call.1
= control target key start
LH: loop header
LB: loop body
LE: loop exit
PB: predicated region body
PF: predicated region fallthrough
CT: control target
= control target key end

     0   :  { %s1914_s0 = inlined_call_operand.hbm [shape: f32[5], index: 0, kind: input, shape index: {}]   ;;  %s1915_s1 = inlined_call_operand.hbm [shape: f32[264,512], index: 1, kind: input, shape index: {}]   ;;  %s1916_s2 = inlined_call_operand.hbm [shape: f32[264,512], index: 2, kind: input, shape index: {}]   ;;  %s1917_s3 = inlined_call_operand.hbm [shape: f32[264,512], index: 3, kind: input, shape index: {}]   ;;  %s1918_s4 = inlined_call_operand.hbm [shape: f32[264,512], index: 4, kind: output, shape index: {}]  }
   0x1   :  { %s1079_s17 = scalar_lea.hbm %s1914_s0, 16 }
   0x2   :  { %p1080_p0 = scmp.ne.s32.totalorder %s1914_s0, %s1079_s17  ;;  %p1083_p1 = scmp.lt.u32.totalorder %s1079_s17, %s1914_s0 }
   0x4   :  { %p1085_p2 = pnand %p1083_p1, %p1080_p0 }
   0x6   :  { %1088 = shalt.err (!%p1085_p2)  }
   0x7   :  { %s1247_s22 = smov [#allocation3]  }
   0x8   :  { %10 = dma.hbm_to_smem %s1914_s0, 16, %s1247_s22, [#allocation2] }
   0x9   :  { %1217 = dma.done.wait [#allocation2], 16 }
   0xa   :  { %1218 = vsyncadd [#allocation2], 4294967280 }
   0xb   :  { %12 = sfence }
   0xc   :  { %13 = vsyncpa [#allocation5], 0 }
   0xd   :  { %15 = vsyncpa [#allocation5 + $0x1], 0 }
   0xe   :  { %16 = vsyncpa [#allocation8], 0 }
   0xf   :  { %18 = vsyncpa [#allocation8 + $0x1], 0 }
  0x10   :  { %19 = vsyncpa [#allocation6], 0 }
  0x11   :  { %21 = vsyncpa [#allocation6 + $0x1], 0  ;;  %s1297_s25 = smov 0   ;;  %s1299_s26 = smov 0  }
  0x12   :  { %s1301_s27 = smov 0   ;;  %s1303_s28 = smov 0  }
  0x13 LB: > { %s1318_s0 = sadd.s32 4294967295, %s1245_s28   ;;  %s971_s29 = sadd.s32 4294967294, %s1245_s28   ;;  %s1245_s28 = sphi %s1303_s28, %s1928_s28   ;;  %s1241_s27 = sphi %s1301_s27, %s1927_s27   ;;  %s1237_s26 = sphi %s1299_s26, %s1926_s26   ;;  %s1233_s25 = sphi %s1297_s25, %s1925_s25  }
  0x14   : > { %s1322_s30 = sadd.s32 1, %s1245_s28   ;;  %s34_s5 = sadd.s32 1, %s1241_s27 }
  0x15   : > { %s31_s6 = ssub.s32 %s1245_s28, %s1322_s30  ;;  %p41_p3 = scmp.ne.s32.totalorder %s1241_s27, %s1237_s26 }
  0x16   : > { %p32_p4 = scmp.eq.s32.totalorder %s31_s6, 0  ;;  %p42_p5 = scmp.eq.s32.totalorder %s1245_s28, 0 }
  0x17   : > { %p47_p6 = scmp.ne.s32.totalorder %s1237_s26, %s1233_s25  ;;  %p48_p7 = scmp.eq.s32.totalorder %s1318_s0, 0 }
  0x18   : > { %s1334_s7 = scalar_select %p32_p4, %s1241_s27, %s34_s5  }
  0x19   : > { %p1336_p8 = por %p42_p5, %p41_p3  ;;  %p1340_p9 = por %p48_p7, %p47_p6 }
  0x1a   : > { %p123_p10 = scmp.eq.s32.totalorder %s1318_s0, 3  ;;  %p129_p11 = scmp.eq.s32.totalorder %s971_s29, 3 }
  0x1b   : > { %p973_p0 = scmp.ge.s32.totalorder %s1245_s28, 4 }
  0x1c   : > { %p1345_p12 = por %p123_p10, %p41_p3  ;;  %p1349_p13 = por %p129_p11, %p47_p6 }
  0x1d   : > { %145 = sbr.rel (%p973_p0) target bundleno = 141 (0x8d), region = 16 }
  0x1e   : > { %s1921_s10 = scalar_select %p1345_p12, 1, 0 }
  0x1f   : > { %s1922_s11 = scalar_select %p1349_p13, 1, 0 }
  0x24   : > { %148 = sbr.rel (!%p1336_p8) target bundleno = 71 (0x47), region = 20  ;;  %s149_s12 = sand.u32 (%p1336_p8), 1, %s1241_s27  }
  0x25   : > { %s154_s13 = smul.u32 (%p1336_p8), 9, %s1245_s28  ;;  %s1361_s18 = scalar_lea.sflag (%p1336_p8), [#allocation5], %s149_s12 }
  0x26   : > { %s1025_s14 = smul.u32 (%p1336_p8), 288, %s149_s12 }
  0x27   : > { %s155_s15 = ssub.s32 (%p1336_p8), 33, %s154_s13 }
  0x28   : > { %p156_p1 = scmp.lt.s32.totalorder (%p1336_p8), %s155_s15, 9  ;;  %s153_s19 = scalar_lea.vmem (%p1336_p8), [#allocation4], %s1025_s14 }
  0x2b   : > { %s1930_s15 = smov (!%p156_p1, %s155_s15), 9 }
  0x2c   : > { %s1358_s16 = sshll.u32 %s1930_s15, 9 }
  0x2d   : > { %s161_s17 = ssub.s32 4608, %s1358_s16 }
  0x2e   : > { %162 = vsyncadd %s1361_s18, %s161_s17  ;;  %p976_p2 = scmp.ne.s32.totalorder %s1358_s16, 0  ;;  %s1021_s20 = smul.u32 4608, %s1245_s28 }
  0x2f   : > { %s168_s21 = sshll.u32 %s153_s19, 4  ;;  %s1093_s12 = scalar_lea.hbm %s1915_s1, 16896  ;;  %s1371_s21 = int_to_ptr.vmem [resolvable:$true] %s168_s21 }
  0x30   : > { %s1369_s24 = scalar_lea.hbm %s1915_s1, %s1021_s20 }
  0x31   : > { %s1089_s29 = scalar_lea.hbm %s1369_s24, %s1358_s16  ;;  %p1094_p6 = scmp.lt.u32.totalorder %s1369_s24, %s1915_s1 }
  0x32   : > { %p1090_p3 = scmp.ne.s32.totalorder %s1369_s24, %s1089_s29  ;;  %p1095_p7 = scmp.lt.u32.totalorder %s1093_s12, %s1089_s29 }
  0x33   : > { %p1097_p11 = scmp.lt.u32.totalorder %s1089_s29, %s1369_s24 }
  0x34   : > { %p1091_p4 = pnand %p1090_p3, %p976_p2  ;;  %p1096_p10 = por %p1095_p7, %p1094_p6 }
  0x36   : > { %p1092_p5 = pneg %p1091_p4  ;;  %p1098_p0 = por %p1097_p11, %p1096_p10 }
  0x38   : > { %p1099_p1 = pnand %p1098_p0, %p1092_p5 }
  0x3a   : > { %1102 = shalt.err (!%p1099_p1)
}
  0x3b   : > { %s1103_s15 = scalar_lea.vmem %s1371_s21, %s1358_s16  ;;  %s1248_s17 = smov [#allocation4]  }
  0x3c   : > { %p1104_p3 = scmp.ne.s32.totalorder %s1371_s21, %s1103_s15  ;;  %s1107_s19 = sshll.u32 %s1248_s17, 4  ;;  %s1108_s19 = int_to_ptr.vmem [resolvable:$false] %s1107_s19 }
  0x3d   : > { %s1109_s20 = scalar_lea.vmem %s1108_s19, 9216  ;;  %p1110_p12 = scmp.lt.s32.totalorder %s1371_s21, %s1108_s19 }
  0x3e   : > { %p1105_p4 = pnand %p1104_p3, %p976_p2  ;;  %p1111_p6 = scmp.lt.s32.totalorder %s1109_s20, %s1103_s15 }
  0x40   : > { %p1106_p13 = pneg %p1105_p4  ;;  %p1112_p7 = por %p1111_p6, %p1110_p12 }
  0x42   : > { %p1113_p10 = pnand %p1112_p7, %p1106_p13 }
  0x44   : > { %1116 = shalt.err (!%p1113_p10)
}
  0x45   : > { %s1249_s22 = smov 512   ;;  %s1250_s23 = smov 32  }
  0x46   : > { %174 = dma.hbm_to_vmem [thread:$0]  (%p976_p2), %s1369_s24, %s1358_s16, %s1371_s21, %s1361_s18, %s1249_s22, %s1249_s22, %s1250_s23  }
  0x47 PF: > { %177 = sbr.rel (!%p1336_p8) target bundleno = 106 (0x6a), region = 24  ;;  %s178_s29 = sand.u32 (%p1336_p8), 1, %s1245_s28  }
  0x48   : > { %s180_s5 = sand.u32 (%p1336_p8), 1, %s1241_s27   ;;  %s183_s12 = smul.u32 (%p1336_p8), 9, %s1245_s28 }
  0x49   : > { %s1026_s6 = smul.u32 (%p1336_p8), 288, %s180_s5  ;;  %s1406_s17 = scalar_lea.sflag (%p1336_p8), [#allocation8], %s178_s29 }
  0x4a   : > { %s184_s13 = ssub.s32 (%p1336_p8), 33, %s183_s12 }
  0x4b   : > { %p185_p12 = scmp.lt.s32.totalorder (%p1336_p8), %s184_s13, 9  ;;  %s182_s16 = scalar_lea.vmem (%p1336_p8), [#allocation7], %s1026_s6 }
  0x4e   : > { %s1932_s13 = smov (!%p185_p12, %s184_s13), 9 }
  0x4f   : > { %s1403_s14 = sshll.u32 %s1932_s13, 9 }
  0x50   : > { %s190_s15 = ssub.s32 4608, %s1403_s14 }
  0x51   : > { %191 = vsyncadd %s1406_s17, %s190_s15  ;;  %p983_p13 = scmp.ne.s32.totalorder %s1403_s14, 0  ;;  %s1022_s18 = smul.u32 4608, %s1245_s28 }
  0x52   : > { %s197_s21 = sshll.u32 %s182_s16, 4  ;;  %s1121_s5 = scalar_lea.hbm %s1916_s2, 16896  ;;  %s1416_s21 = int_to_ptr.vmem [resolvable:$true] %s197_s21 }
  0x53   : > { %s1414_s20 = scalar_lea.hbm %s1916_s2, %s1022_s18 }
  0x54   : > { %s1117_s22 = scalar_lea.hbm %s1414_s20, %s1403_s14  ;;  %p1122_p0 = scmp.lt.u32.totalorder %s1414_s20, %s1916_s2 }
  0x55   : > { %p1118_p2 = scmp.ne.s32.totalorder %s1414_s20, %s1117_s22  ;;  %p1123_p1 = scmp.lt.u32.totalorder %s1121_s5, %s1117_s22 }
  0x56   : > { %p1125_p4 = scmp.lt.u32.totalorder %s1117_s22, %s1414_s20 }
  0x57   : > { %p1119_p5 = pnand %p1118_p2, %p983_p13  ;;  %p1124_p3 = por %p1123_p1, %p1122_p0 }
  0x59   : > { %p1120_p11 = pneg %p1119_p5  ;;  %p1126_p6 = por %p1125_p4, %p1124_p3 }
  0x5b   : > { %p1127_p7 = pnand %p1126_p6, %p1120_p11 }
  0x5d   : > { %1130 = shalt.err (!%p1127_p7)
}
  0x5e   : > { %s1131_s13 = scalar_lea.vmem %s1416_s21, %s1403_s14  ;;  %s1251_s15 = smov [#allocation7]  }
  0x5f   : > { %p1132_p10 = scmp.ne.s32.totalorder %s1416_s21, %s1131_s13  ;;  %s1135_s16 = sshll.u32 %s1251_s15, 4  ;;  %s1136_s16 = int_to_ptr.vmem [resolvable:$false] %s1135_s16 }
  0x60   : > { %s1137_s18 = scalar_lea.vmem %s1136_s16, 9216  ;;  %p1138_p5 = scmp.lt.s32.totalorder %s1416_s21, %s1136_s16 }
  0x61   : > { %p1133_p12 = pnand %p1132_p10, %p983_p13  ;;  %p1139_p0 = scmp.lt.s32.totalorder %s1137_s18, %s1131_s13 }
  0x63   : > { %p1134_p2 = pneg %p1133_p12  ;;  %p1140_p1 = por %p1139_p0, %p1138_p5 }
  0x65   : > { %p1141_p3 = pnand %p1140_p1, %p1134_p2 }
  0x67   : > { %1144 = shalt.err (!%p1141_p3)
}
  0x68   : > { %s1252_s24 = smov 512   ;;  %s1253_s19 = smov 32  }
  0x69   : > { %203 = dma.hbm_to_vmem [thread:$0]  (%p983_p13), %s1414_s20, %s1403_s14, %s1416_s21, %s1406_s17, %s1252_s24, %s1252_s24, %s1253_s19  }
  0x6a PF: > { %206 = sbr.rel (!%p1336_p8) target bundleno = 141 (0x8d), region = 28  ;;  %s207_s22 = sand.u32 (%p1336_p8), 1, %s1245_s28  }
  0x6b   : > { %s209_s23 = sand.u32 (%p1336_p8), 1, %s1241_s27   ;;  %s212_s5 = smul.u32 (%p1336_p8), 9, %s1245_s28 }
  0x6c   : > { %s1027_s29 = smul.u32 (%p1336_p8), 288, %s209_s23  ;;  %s1451_s15 = scalar_lea.sflag (%p1336_p8), [#allocation8], %s207_s22 }
  0x6d   : > { %s213_s6 = ssub.s32 (%p1336_p8), 33, %s212_s5 }
  0x6e   : > { %p214_p11 = scmp.lt.s32.totalorder (%p1336_p8), %s213_s6, 9  ;;  %s211_s14 = scalar_lea.vmem (%p1336_p8), [#allocation9], %s1027_s29 }
  0x71   : > { %s1934_s6 = smov (!%p214_p11, %s213_s6), 9 }
  0x72   : > { %s1448_s12 = sshll.u32 %s1934_s6, 9 }
  0x73   : > { %s219_s13 = ssub.s32 4608, %s1448_s12 }
  0x74   : > { %220 = vsyncadd %s1451_s15, %s219_s13  ;;  %p990_p8 = scmp.ne.s32.totalorder %s1448_s12, 0  ;;  %s1023_s8 = smul.u32 4608, %s1245_s28 }
  0x75   : > { %s226_s17 = sshll.u32 %s211_s14, 4  ;;  %s1149_s22 = scalar_lea.hbm %s1917_s3, 16896  ;;  %s1461_s17 = int_to_ptr.vmem [resolvable:$true] %s226_s17 }
  0x76   : > { %s1459_s16 = scalar_lea.hbm %s1917_s3, %s1023_s8 }
  0x77   : > { %s1145_s18 = scalar_lea.hbm %s1459_s16, %s1448_s12  ;;  %p1150_p7 = scmp.lt.u32.totalorder %s1459_s16, %s1917_s3 }
  0x78   : > { %p1146_p13 = scmp.ne.s32.totalorder %s1459_s16, %s1145_s18  ;;  %p1151_p10 = scmp.lt.u32.totalorder %s1149_s22, %s1145_s18 }
  0x79   : > { %p1153_p2 = scmp.lt.u32.totalorder %s1145_s18, %s1459_s16 }
  0x7a   : > { %p1147_p4 = pnand %p1146_p13, %p990_p8  ;;  %p1152_p12 = por %p1151_p10, %p1150_p7 }
  0x7c   : > { %p1148_p6 = pneg %p1147_p4  ;;  %p1154_p5 = por %p1153_p2, %p1152_p12 }
  0x7e   : > { %p1155_p0 = pnand %p1154_p5, %p1148_p6 }
  0x80   : > { %1158 = shalt.err (!%p1155_p0)
}
  0x81   : > { %s1159_s5 = scalar_lea.vmem %s1461_s17, %s1448_s12  ;;  %s1254_s6 = smov [#allocation9]  }
  0x82   : > { %p1160_p1 = scmp.ne.s32.totalorder %s1461_s17, %s1159_s5  ;;  %s1163_s13 = sshll.u32 %s1254_s6, 4  ;;  %s1164_s13 = int_to_ptr.vmem [resolvable:$false] %s1163_s13 }
  0x83   : > { %s1165_s14 = scalar_lea.vmem %s1164_s13, 9216  ;;  %p1166_p13 = scmp.lt.s32.totalorder %s1461_s17, %s1164_s13 }
  0x84   : > { %p1161_p3 = pnand %p1160_p1, %p990_p8  ;;  %p1167_p4 = scmp.lt.s32.totalorder %s1165_s14, %s1159_s5 }
  0x86   : > { %p1162_p11 = pneg %p1161_p3  ;;  %p1168_p7 = por %p1167_p4, %p1166_p13 }
  0x88   : > { %p1169_p10 = pnand %p1168_p7, %p1162_p11 }
  0x8a   : > { %1172 = shalt.err (!%p1169_p10)
}
  0x8b   : > { %s1255_s8 = smov 512   ;;  %s1256_s21 = smov 32  }
  0x8c   : > { %232 = dma.hbm_to_vmem [thread:$0]  (%p990_p8), %s1459_s16, %s1448_s12, %s1461_s17, %s1451_s15, %s1255_s8, %s1255_s8, %s1256_s21  }
  0x8d PF: > { %p995_p6 = scmp.ge.s32.totalorder %s1245_s28, 1  ;;  %p234_p12 = scmp.lt.s32.totalorder %s1245_s28, 5 }
  0x8f   : > { %p235_p2 = pnand %p995_p6, %p234_p12 }
  0x90   : > { %s1491_s20 = sand.u32 (!%p235_p2), 1, %s1237_s26  }
  0x91   : > { %238 = sbr.rel (%p235_p2) target bundleno = 286 (0x11e), region = 32  ;;  %s241_s24 = scalar_lea.sflag (!%p235_p2), [#allocation5], %s1491_s20 }
  0x92   : > { %s1494_s18 = smul.u32 (!%p235_p2), 288, %s1491_s20 }
  0x94   : > { %s1498_s19 = scalar_lea.vmem (!%p235_p2), [#allocation4], %s1494_s18 }
  0x98   : > { %1220 = dma.done.wait (%p1340_p9), %s241_s24, 4608  }
  0x99   : > { %1222 = vsyncadd (%p1340_p9), %s241_s24, 4294962688  ;;  %s249_s12 = sand.u32 1, %s1318_s0   ;;  %s1506_s17 = scalar_lea.vmem [#allocation7], %s1494_s18 }
  0x9a   : > { %s250_s15 = scalar_lea.sflag [#allocation8], %s249_s12 }
  0x9b   : > { %1224 = dma.done.wait (%p1340_p9), %s250_s15, 9216  }
  0x9c   : > { %1226 = vsyncadd (%p1340_p9), %s250_s15, 4294958080  ;;  %s319_s16 = sld [smem:[#allocation3]]  ;;  %s996_s22 = sld [smem:[#allocation3 + $0x1]]  ;;  %v324_v0 = vld [vmem:[%s1498_s19] sm:$0xff]  ;;  %v325_v8 = vld [vmem:[%s1498_s19 + $0x8] sm:$0xff] }
  0x9d   : > { %s997_s23 = sld [smem:[#allocation3 + $0x2]]  ;;  %s998_s29 = sld [smem:[#allocation3 + $0x3]]  ;;  %v360_v1 = vld [vmem:[%s1506_s17] sm:$0xff]  ;;  %v361_v9 = vld [vmem:[%s1506_s17 + $0x8] sm:$0xff]  ;;  %v326_v15 = vld [vmem:[%s1498_s19 + $0x10] sm:$0xff] }
  0x9e   : > { %s999_s5 = sld [smem:[#allocation3 + $0x4]]  ;;  %s1515_s6 = scalar_lea.vmem [#allocation9], %s1494_s18  ;;  %v469_v5 = vsub.f32 %v324_v0, %v360_v1  ;;  %v470_v14 = vsub.f32 %v325_v8, %v361_v9  ;;  %v362_v20 = vld [vmem:[%s1506_s17 + $0x10] sm:$0xff]  ;;  %v327_v26 = vld [vmem:[%s1498_s19 + $0x18] sm:$0xff]  ;;  %v328_v41 = vld [vmem:[%s1498_s19 + $0x20] sm:$0xff] }
  0x9f   : > { %v396_v2 = vld [vmem:[%s1515_s6] sm:$0xff]  ;;  %v397_v13 = vld [vmem:[%s1515_s6 + $0x8] sm:$0xff]  ;;  %v398_v21 = vld [vmem:[%s1515_s6 + $0x10] sm:$0xff]  ;;  %v471_v32 = vsub.f32 %v326_v15, %v362_v20  ;;  %s1564_s9 = scalar_lea.vmem [#allocation10], %s1494_s18  ;;  %s834_s13 = scalar_lea.sflag [#allocation6], %s1491_s20 }
  0xa0   : > { %v505_v16 = vmul.f32 1.0012, %v469_v5  ;;  %v506_v23 = vmul.f32 1.0012, %v470_v14  ;;  %v363_v27 = vld [vmem:[%s1506_s17 + $0x18] sm:$0xff]  ;;  %v364_v42 = vld [vmem:[%s1506_s17 + $0x20] sm:$0xff] }
  0xa1   : > { %v399_v28 = vld [vmem:[%s1515_s6 + $0x18] sm:$0xff]  ;;  %v507_v38 = vmul.f32 1.0012, %v471_v32  ;;  %v472_v40 = vsub.f32 %v327_v26, %v363_v27  ;;  %v400_v43 = vld [vmem:[%s1515_s6 + $0x20] sm:$0xff]  ;;  %v329_v52 = vld [vmem:[%s1498_s19 + $0x28] sm:$0xff]  ;;  %v473_v58 = vsub.f32 %v328_v41, %v364_v42  ;;  %p1923_p9 = scmp.ne.s32.totalorder %s1921_s10, 0 }
  0xa2   : > { %v1518_v3 = vstv %s319_s16  ;;  %v1523_v7 = vstv %s996_s22  ;;  %v365_v53 = vld [vmem:[%s1506_s17 + $0x28] sm:$0xff]  ;;  %v366_v5 = vld [vmem:[%s1506_s17 + $0x30] sm:$0xff]  ;;  %s841_s14 = smul.u32 (%p1923_p9), 9, %s1318_s0 }
  0xa3   : > { %v433_v4 = vmul.f32 %v1518_v3, %v396_v2  ;;  %v1521_v6 = vstv %s998_s29  ;;  %v1530_v12 = vstv %s997_s23  ;;  %v434_v18 = vmul.f32 %v1518_v3, %v397_v13  ;;  %v401_v54 = vld [vmem:[%s1515_s6 + $0x28] sm:$0xff]  ;;  %v402_v8 = vld [vmem:[%s1515_s6 + $0x30] sm:$0xff] }
  0xa4   : > { %v578_v10 = vsub.f32 %v360_v1, %v1521_v6  ;;  %v1528_v11 = vstv %s999_s5  ;;  %v579_v19 = vsub.f32 %v361_v9, %v1521_v6  ;;  %v435_v25 = vmul.f32 %v1518_v3, %v398_v21  ;;  %v403_v21 = vld [vmem:[%s1515_s6 + $0x38] sm:$0xff]  ;;  %s842_s8 = ssub.s32 (%p1923_p9), 33, %s841_s14 }
  0xa5   : > { %v688_v17 = vsub.f32 %v1528_v11, %v360_v1  ;;  %v689_v24 = vsub.f32 %v1528_v11, %v361_v9  ;;  %v541_v29 = vsub.f32 %v433_v4, %v505_v16  ;;  %v542_v33 = vsub.f32 %v434_v18, %v506_v23  ;;  %v330_v4 = vld [vmem:[%s1498_s19 + $0x30] sm:$0xff]  ;;  %p843_p8 = scmp.lt.s32.totalorder (%p1923_p9), %s842_s8, 9 }
  0xa6   : > { %v615_v22 = vmul.f32 %v1523_v7, %v578_v10  ;;  %v616_v31 = vmul.f32 %v1523_v7, %v579_v19  ;;  %v580_v35 = vsub.f32 %v362_v20, %v1521_v6  ;;  %v690_v36 = vsub.f32 %v1528_v11, %v362_v20  ;;  %v331_v19 = vld [vmem:[%s1498_s19 + $0x38] sm:$0xff] }
  0xa7   : > { %v725_v30 = vmul.f32 %v1530_v12, %v688_v17  ;;  %v726_v34 = vmul.f32 %v1530_v12, %v689_v24  ;;  %v436_v39 = vmul.f32 %v1518_v3, %v399_v28  ;;  %v581_v47 = vsub.f32 %v363_v27, %v1521_v6  ;;  %v367_v20 = vld [vmem:[%s1506_s17 + $0x38] sm:$0xff] }
  0xa8   : > { %v651_v37 = vsub.f32 %v541_v29, %v615_v22  ;;  %v652_v44 = vsub.f32 %v542_v33, %v616_v31  ;;  %v617_v45 = vmul.f32 %v1523_v7, %v580_v35  ;;  %v727_v46 = vmul.f32 %v1530_v12, %v690_v36  ;;  %v368_v35 = vld [vmem:[%s1506_s17 + $0x40] sm:$0xff] }
  0xa9   : > { %v543_v49 = vsub.f32 %v435_v25, %v507_v38  ;;  %v508_v50 = vmul.f32 1.0012, %v472_v40  ;;  %v691_v51 = vsub.f32 %v1528_v11, %v363_v27  ;;  %v618_v56 = vmul.f32 %v1523_v7, %v581_v47  ;;  %v404_v36 = vld [vmem:[%s1515_s6 + $0x40] sm:$0xff]  ;;  %v405_v47 = vld [vmem:[%s1515_s6 + $0x48] sm:$0xff] }
  0xaa   : > { %v761_v48 = vsub.f32 %v651_v37, %v725_v30  ;;  %v762_v55 = vsub.f32 %v652_v44, %v726_v34  ;;  %v437_v57 = vmul.f32 %v1518_v3, %v400_v43  ;;  %v582_v62 = vsub.f32 %v364_v42, %v1521_v6  ;;  %v332_v34 = vld [vmem:[%s1498_s19 + $0x40] sm:$0xff] }
  0xab   : > { %v653_v59 = vsub.f32 %v543_v49, %v617_v45  ;;  %v544_v60 = vsub.f32 %v436_v39, %v508_v50  ;;  %v728_v61 = vmul.f32 %v1530_v12, %v691_v51  ;;  %v509_v63 = vmul.f32 1.0012, %v473_v58  ;;  %v333_v45 = vld [vmem:[%s1498_s19 + $0x48] sm:$0xff] }
  0xac   : > { %797 = vst [vmem:[%s1564_s9] sm:$0xff] %v761_v48  ;;  %798 = vst [vmem:[%s1564_s9 + $0x8] sm:$0xff] %v762_v55  ;;  %v692_v0 = vsub.f32 %v1528_v11, %v364_v42  ;;  %v438_v1 = vmul.f32 %v1518_v3, %v401_v54  ;;  %v474_v2 = vsub.f32 %v329_v52, %v365_v53 }
  0xad   : > { %v763_v9 = vsub.f32 %v653_v59, %v727_v46  ;;  %v654_v10 = vsub.f32 %v544_v60, %v618_v56  ;;  %v619_v13 = vmul.f32 %v1523_v7, %v582_v62  ;;  %v583_v14 = vsub.f32 %v365_v53, %v1521_v6  ;;  %v369_v46 = vld [vmem:[%s1506_s17 + $0x48] sm:$0xff]  ;;  %v334_v60 = vld [vmem:[%s1498_s19 + $0x50] sm:$0xff] }
  0xae   : > { %v545_v15 = vsub.f32 %v437_v57, %v509_v63  ;;  %v729_v16 = vmul.f32 %v1530_v12, %v692_v0  ;;  %v510_v17 = vmul.f32 1.0012, %v474_v2  ;;  %v693_v18 = vsub.f32 %v1528_v11, %v365_v53  ;;  %v406_v62 = vld [vmem:[%s1515_s6 + $0x50] sm:$0xff] }
  0xaf   : > { %799 = vst [vmem:[%s1564_s9 + $0x10] sm:$0xff] %v763_v9  ;;  %v764_v22 = vsub.f32 %v654_v10, %v728_v61  ;;  %v620_v23 = vmul.f32 %v1523_v7, %v583_v14  ;;  %v439_v24 = vmul.f32 %v1518_v3, %v402_v8  ;;  %v475_v25 = vsub.f32 %v330_v4, %v366_v5  ;;  %v370_v61 = vld [vmem:[%s1506_s17 + $0x50] sm:$0xff]  ;;  %v335_v10 = vld [vmem:[%s1498_s19 + $0x58] sm:$0xff] }
  0xb0   : > { %v655_v26 = vsub.f32 %v545_v15, %v619_v13  ;;  %v546_v27 = vsub.f32 %v438_v1, %v510_v17  ;;  %v730_v28 = vmul.f32 %v1530_v12, %v693_v18  ;;  %v584_v29 = vsub.f32 %v366_v5, %v1521_v6  ;;  %v371_v13 = vld [vmem:[%s1506_s17 + $0x58] sm:$0xff] }
  0xb1   : > { %800 = vst [vmem:[%s1564_s9 + $0x18] sm:$0xff] %v764_v22  ;;  %v511_v30 = vmul.f32 1.0012, %v475_v25  ;;  %v694_v31 = vsub.f32 %v1528_v11, %v366_v5  ;;  %v440_v32 = vmul.f32 %v1518_v3, %v403_v21  ;;  %v476_v33 = vsub.f32 %v331_v19, %v367_v20  ;;  %v407_v14 = vld [vmem:[%s1515_s6 + $0x58] sm:$0xff] }
  0xb2   : > { %v765_v37 = vsub.f32 %v655_v26, %v729_v16  ;;  %v656_v38 = vsub.f32 %v546_v27, %v620_v23  ;;  %v621_v39 = vmul.f32 %v1523_v7, %v584_v29  ;;  %v585_v40 = vsub.f32 %v367_v20, %v1521_v6  ;;  %v336_v27 = vld [vmem:[%s1498_s19 + $0x60] sm:$0xff] }
  0xb3   : > { %v547_v41 = vsub.f32 %v439_v24, %v511_v30  ;;  %v731_v42 = vmul.f32 %v1530_v12, %v694_v31  ;;  %v512_v43 = vmul.f32 1.0012, %v476_v33  ;;  %v695_v44 = vsub.f32 %v1528_v11, %v367_v20  ;;  %v408_v29 = vld [vmem:[%s1515_s6 + $0x60] sm:$0xff] }
  0xb4   : > { %801 = vst [vmem:[%s1564_s9 + $0x20] sm:$0xff] %v765_v37  ;;  %v766_v48 = vsub.f32 %v656_v38, %v730_v28  ;;  %v622_v49 = vmul.f32 %v1523_v7, %v585_v40  ;;  %v441_v50 = vmul.f32 %v1518_v3, %v404_v36  ;;  %v477_v51 = vsub.f32 %v332_v34, %v368_v35  ;;  %v372_v28 = vld [vmem:[%s1506_s17 + $0x60] sm:$0xff]  ;;  %v337_v38 = vld [vmem:[%s1498_s19 + $0x68] sm:$0xff] }
  0xb5   : > { %v657_v52 = vsub.f32 %v547_v41, %v621_v39  ;;  %v548_v53 = vsub.f32 %v440_v32, %v512_v43  ;;  %v732_v54 = vmul.f32 %v1530_v12, %v695_v44  ;;  %v586_v55 = vsub.f32 %v368_v35, %v1521_v6  ;;  %v373_v39 = vld [vmem:[%s1506_s17 + $0x68] sm:$0xff] }
  0xb6   : > { %802 = vst [vmem:[%s1564_s9 + $0x28] sm:$0xff] %v766_v48  ;;  %v513_v56 = vmul.f32 1.0012, %v477_v51  ;;  %v696_v57 = vsub.f32 %v1528_v11, %v368_v35  ;;  %v442_v58 = vmul.f32 %v1518_v3, %v405_v47  ;;  %v478_v59 = vsub.f32 %v333_v45, %v369_v46  ;;  %v409_v40 = vld [vmem:[%s1515_s6 + $0x68] sm:$0xff] }
  0xb7   : > { %v767_v63 = vsub.f32 %v657_v52, %v731_v42  ;;  %v658_v0 = vsub.f32 %v548_v53, %v622_v49  ;;  %v623_v1 = vmul.f32 %v1523_v7, %v586_v55  ;;  %v587_v2 = vsub.f32 %v369_v46, %v1521_v6  ;;  %v338_v53 = vld [vmem:[%s1498_s19 + $0x70] sm:$0xff] }
  0xb8   : > { %v549_v4 = vsub.f32 %v441_v50, %v513_v56  ;;  %v733_v5 = vmul.f32 %v1530_v12, %v696_v57  ;;  %v514_v8 = vmul.f32 1.0012, %v478_v59  ;;  %v697_v9 = vsub.f32 %v1528_v11, %v369_v46  ;;  %v410_v55 = vld [vmem:[%s1515_s6 + $0x70] sm:$0xff] }
  0xb9   : > { %803 = vst [vmem:[%s1564_s9 + $0x30] sm:$0xff] %v767_v63  ;;  %v768_v15 = vsub.f32 %v658_v0, %v732_v54  ;;  %v624_v16 = vmul.f32 %v1523_v7, %v587_v2  ;;  %v443_v17 = vmul.f32 %v1518_v3, %v406_v62  ;;  %v479_v18 = vsub.f32 %v334_v60, %v370_v61  ;;  %v374_v54 = vld [vmem:[%s1506_s17 + $0x70] sm:$0xff]  ;;  %v339_v0 = vld [vmem:[%s1498_s19 + $0x78] sm:$0xff] }
  0xba   : > { %v659_v19 = vsub.f32 %v549_v4, %v623_v1  ;;  %v550_v20 = vsub.f32 %v442_v58, %v514_v8  ;;  %v734_v21 = vmul.f32 %v1530_v12, %v697_v9  ;;  %v588_v22 = vsub.f32 %v370_v61, %v1521_v6  ;;  %v375_v1 = vld [vmem:[%s1506_s17 + $0x78] sm:$0xff] }
  0xbb   : > { %804 = vst [vmem:[%s1564_s9 + $0x38] sm:$0xff] %v768_v15  ;;  %v515_v23 = vmul.f32 1.0012, %v479_v18  ;;  %v698_v24 = vsub.f32 %v1528_v11, %v370_v61  ;;  %v444_v25 = vmul.f32 %v1518_v3, %v407_v14  ;;  %v480_v26 = vsub.f32 %v335_v10, %v371_v13  ;;  %v411_v2 = vld [vmem:[%s1515_s6 + $0x78] sm:$0xff] }
  0xbc   : > { %v769_v30 = vsub.f32 %v659_v19, %v733_v5  ;;  %v660_v31 = vsub.f32 %v550_v20, %v624_v16  ;;  %v625_v32 = vmul.f32 %v1523_v7, %v588_v22  ;;  %v589_v33 = vsub.f32 %v371_v13, %v1521_v6  ;;  %v340_v20 = vld [vmem:[%s1498_s19 + $0x80] sm:$0xff] }
  0xbd   : > { %v551_v34 = vsub.f32 %v443_v17, %v515_v23  ;;  %v735_v35 = vmul.f32 %v1530_v12, %v698_v24  ;;  %v516_v36 = vmul.f32 1.0012, %v480_v26  ;;  %v699_v37 = vsub.f32 %v1528_v11, %v371_v13  ;;  %v412_v22 = vld [vmem:[%s1515_s6 + $0x80] sm:$0xff] }
  0xbe   : > { %805 = vst [vmem:[%s1564_s9 + $0x40] sm:$0xff] %v769_v30  ;;  %v770_v41 = vsub.f32 %v660_v31, %v734_v21  ;;  %v626_v42 = vmul.f32 %v1523_v7, %v589_v33  ;;  %v445_v43 = vmul.f32 %v1518_v3, %v408_v29  ;;  %v481_v44 = vsub.f32 %v336_v27, %v372_v28  ;;  %v376_v21 = vld [vmem:[%s1506_s17 + $0x80] sm:$0xff]  ;;  %v341_v31 = vld [vmem:[%s1498_s19 + $0x88] sm:$0xff] }
  0xbf   : > { %v661_v45 = vsub.f32 %v551_v34, %v625_v32  ;;  %v552_v46 = vsub.f32 %v444_v25, %v516_v36  ;;  %v736_v47 = vmul.f32 %v1530_v12, %v699_v37  ;;  %v590_v48 = vsub.f32 %v372_v28, %v1521_v6  ;;  %v377_v32 = vld [vmem:[%s1506_s17 + $0x88] sm:$0xff] }
  0xc0   : > { %806 = vst [vmem:[%s1564_s9 + $0x48] sm:$0xff] %v770_v41  ;;  %v517_v49 = vmul.f32 1.0012, %v481_v44  ;;  %v700_v50 = vsub.f32 %v1528_v11, %v372_v28  ;;  %v446_v51 = vmul.f32 %v1518_v3, %v409_v40  ;;  %v482_v52 = vsub.f32 %v337_v38, %v373_v39  ;;  %v413_v33 = vld [vmem:[%s1515_s6 + $0x88] sm:$0xff] }
  0xc1   : > { %v771_v56 = vsub.f32 %v661_v45, %v735_v35  ;;  %v662_v57 = vsub.f32 %v552_v46, %v626_v42  ;;  %v627_v58 = vmul.f32 %v1523_v7, %v590_v48  ;;  %v591_v59 = vsub.f32 %v373_v39, %v1521_v6  ;;  %v342_v46 = vld [vmem:[%s1498_s19 + $0x90] sm:$0xff] }
  0xc2   : > { %v553_v60 = vsub.f32 %v445_v43, %v517_v49  ;;  %v737_v61 = vmul.f32 %v1530_v12, %v700_v50  ;;  %v518_v62 = vmul.f32 1.0012, %v482_v52  ;;  %v701_v63 = vsub.f32 %v1528_v11, %v373_v39  ;;  %v414_v48 = vld [vmem:[%s1515_s6 + $0x90] sm:$0xff] }
  0xc3   : > { %807 = vst [vmem:[%s1564_s9 + $0x50] sm:$0xff] %v771_v56  ;;  %v772_v4 = vsub.f32 %v662_v57, %v736_v47  ;;  %v628_v5 = vmul.f32 %v1523_v7, %v591_v59  ;;  %v447_v8 = vmul.f32 %v1518_v3, %v410_v55  ;;  %v483_v9 = vsub.f32 %v338_v53, %v374_v54  ;;  %v378_v47 = vld [vmem:[%s1506_s17 + $0x90] sm:$0xff]  ;;  %v343_v57 = vld [vmem:[%s1498_s19 + $0x98] sm:$0xff] }
  0xc4   : > { %v663_v10 = vsub.f32 %v553_v60, %v627_v58  ;;  %v554_v13 = vsub.f32 %v446_v51, %v518_v62  ;;  %v738_v14 = vmul.f32 %v1530_v12, %v701_v63  ;;  %v592_v15 = vsub.f32 %v374_v54, %v1521_v6  ;;  %v379_v58 = vld [vmem:[%s1506_s17 + $0x98] sm:$0xff] }
  0xc5   : > { %808 = vst [vmem:[%s1564_s9 + $0x58] sm:$0xff] %v772_v4  ;;  %v519_v16 = vmul.f32 1.0012, %v483_v9  ;;  %v702_v17 = vsub.f32 %v1528_v11, %v374_v54  ;;  %v448_v18 = vmul.f32 %v1518_v3, %v411_v2  ;;  %v484_v19 = vsub.f32 %v339_v0, %v375_v1  ;;  %v415_v59 = vld [vmem:[%s1515_s6 + $0x98] sm:$0xff] }
  0xc6   : > { %v773_v23 = vsub.f32 %v663_v10, %v737_v61  ;;  %v664_v24 = vsub.f32 %v554_v13, %v628_v5  ;;  %v629_v25 = vmul.f32 %v1523_v7, %v592_v15  ;;  %v593_v26 = vsub.f32 %v375_v1, %v1521_v6  ;;  %v344_v13 = vld [vmem:[%s1498_s19 + $0xa0] sm:$0xff] }
  0xc7   : > { %v555_v27 = vsub.f32 %v447_v8, %v519_v16  ;;  %v739_v28 = vmul.f32 %v1530_v12, %v702_v17  ;;  %v520_v29 = vmul.f32 1.0012, %v484_v19  ;;  %v703_v30 = vsub.f32 %v1528_v11, %v375_v1  ;;  %v416_v15 = vld [vmem:[%s1515_s6 + $0xa0] sm:$0xff] }
  0xc8   : > { %809 = vst [vmem:[%s1564_s9 + $0x60] sm:$0xff] %v773_v23  ;;  %v774_v34 = vsub.f32 %v664_v24, %v738_v14  ;;  %v630_v35 = vmul.f32 %v1523_v7, %v593_v26  ;;  %v449_v36 = vmul.f32 %v1518_v3, %v412_v22  ;;  %v485_v37 = vsub.f32 %v340_v20, %v376_v21  ;;  %v380_v14 = vld [vmem:[%s1506_s17 + $0xa0] sm:$0xff]  ;;  %v345_v24 = vld [vmem:[%s1498_s19 + $0xa8] sm:$0xff] }
  0xc9   : > { %v665_v38 = vsub.f32 %v555_v27, %v629_v25  ;;  %v556_v39 = vsub.f32 %v448_v18, %v520_v29  ;;  %v740_v40 = vmul.f32 %v1530_v12, %v703_v30  ;;  %v594_v41 = vsub.f32 %v376_v21, %v1521_v6  ;;  %v381_v25 = vld [vmem:[%s1506_s17 + $0xa8] sm:$0xff] }
  0xca   : > { %810 = vst [vmem:[%s1564_s9 + $0x68] sm:$0xff] %v774_v34  ;;  %v521_v42 = vmul.f32 1.0012, %v485_v37  ;;  %v704_v43 = vsub.f32 %v1528_v11, %v376_v21  ;;  %v450_v44 = vmul.f32 %v1518_v3, %v413_v33  ;;  %v486_v45 = vsub.f32 %v341_v31, %v377_v32  ;;  %v417_v26 = vld [vmem:[%s1515_s6 + $0xa8] sm:$0xff] }
  0xcb   : > { %v775_v49 = vsub.f32 %v665_v38, %v739_v28  ;;  %v666_v50 = vsub.f32 %v556_v39, %v630_v35  ;;  %v631_v51 = vmul.f32 %v1523_v7, %v594_v41  ;;  %v595_v52 = vsub.f32 %v377_v32, %v1521_v6  ;;  %v346_v39 = vld [vmem:[%s1498_s19 + $0xb0] sm:$0xff] }
  0xcc   : > { %v557_v53 = vsub.f32 %v449_v36, %v521_v42  ;;  %v741_v54 = vmul.f32 %v1530_v12, %v704_v43  ;;  %v522_v55 = vmul.f32 1.0012, %v486_v45  ;;  %v705_v56 = vsub.f32 %v1528_v11, %v377_v32  ;;  %v418_v41 = vld [vmem:[%s1515_s6 + $0xb0] sm:$0xff] }
  0xcd   : > { %811 = vst [vmem:[%s1564_s9 + $0x70] sm:$0xff] %v775_v49  ;;  %v776_v60 = vsub.f32 %v666_v50, %v740_v40  ;;  %v632_v61 = vmul.f32 %v1523_v7, %v595_v52  ;;  %v451_v62 = vmul.f32 %v1518_v3, %v414_v48  ;;  %v487_v63 = vsub.f32 %v342_v46, %v378_v47  ;;  %v382_v40 = vld [vmem:[%s1506_s17 + $0xb0] sm:$0xff]  ;;  %v347_v50 = vld [vmem:[%s1498_s19 + $0xb8] sm:$0xff] }
  0xce   : > { %v667_v0 = vsub.f32 %v557_v53, %v631_v51  ;;  %v558_v1 = vsub.f32 %v450_v44, %v522_v55  ;;  %v742_v2 = vmul.f32 %v1530_v12, %v705_v56  ;;  %v596_v4 = vsub.f32 %v378_v47, %v1521_v6  ;;  %v383_v51 = vld [vmem:[%s1506_s17 + $0xb8] sm:$0xff] }
  0xcf   : > { %812 = vst [vmem:[%s1564_s9 + $0x78] sm:$0xff] %v776_v60  ;;  %v523_v5 = vmul.f32 1.0012, %v487_v63  ;;  %v706_v8 = vsub.f32 %v1528_v11, %v378_v47  ;;  %v452_v9 = vmul.f32 %v1518_v3, %v415_v59  ;;  %v488_v10 = vsub.f32 %v343_v57, %v379_v58  ;;  %v419_v52 = vld [vmem:[%s1515_s6 + $0xb8] sm:$0xff] }
  0xd0   : > { %v777_v16 = vsub.f32 %v667_v0, %v741_v54  ;;  %v668_v17 = vsub.f32 %v558_v1, %v632_v61  ;;  %v633_v18 = vmul.f32 %v1523_v7, %v596_v4  ;;  %v597_v19 = vsub.f32 %v379_v58, %v1521_v6  ;;  %v348_v1 = vld [vmem:[%s1498_s19 + $0xc0] sm:$0xff] }
  0xd1   : > { %v559_v20 = vsub.f32 %v451_v62, %v523_v5  ;;  %v743_v21 = vmul.f32 %v1530_v12, %v706_v8  ;;  %v524_v22 = vmul.f32 1.0012, %v488_v10  ;;  %v707_v23 = vsub.f32 %v1528_v11, %v379_v58  ;;  %v420_v4 = vld [vmem:[%s1515_s6 + $0xc0] sm:$0xff] }
  0xd2   : > { %813 = vst [vmem:[%s1564_s9 + $0x80] sm:$0xff] %v777_v16  ;;  %v778_v27 = vsub.f32 %v668_v17, %v742_v2  ;;  %v634_v28 = vmul.f32 %v1523_v7, %v597_v19  ;;  %v453_v29 = vmul.f32 %v1518_v3, %v416_v15  ;;  %v489_v30 = vsub.f32 %v344_v13, %v380_v14  ;;  %v384_v2 = vld [vmem:[%s1506_s17 + $0xc0] sm:$0xff]  ;;  %v349_v17 = vld [vmem:[%s1498_s19 + $0xc8] sm:$0xff] }
  0xd3   : > { %v669_v31 = vsub.f32 %v559_v20, %v633_v18  ;;  %v560_v32 = vsub.f32 %v452_v9, %v524_v22  ;;  %v744_v33 = vmul.f32 %v1530_v12, %v707_v23  ;;  %v598_v34 = vsub.f32 %v380_v14, %v1521_v6  ;;  %v385_v18 = vld [vmem:[%s1506_s17 + $0xc8] sm:$0xff] }
  0xd4   : > { %814 = vst [vmem:[%s1564_s9 + $0x88] sm:$0xff] %v778_v27  ;;  %v525_v35 = vmul.f32 1.0012, %v489_v30  ;;  %v708_v36 = vsub.f32 %v1528_v11, %v380_v14  ;;  %v454_v37 = vmul.f32 %v1518_v3, %v417_v26  ;;  %v490_v38 = vsub.f32 %v345_v24, %v381_v25  ;;  %v421_v19 = vld [vmem:[%s1515_s6 + $0xc8] sm:$0xff] }
  0xd5   : > { %v779_v42 = vsub.f32 %v669_v31, %v743_v21  ;;  %v670_v43 = vsub.f32 %v560_v32, %v634_v28  ;;  %v635_v44 = vmul.f32 %v1523_v7, %v598_v34  ;;  %v599_v45 = vsub.f32 %v381_v25, %v1521_v6  ;;  %v350_v32 = vld [vmem:[%s1498_s19 + $0xd0] sm:$0xff] }
  0xd6   : > { %v561_v46 = vsub.f32 %v453_v29, %v525_v35  ;;  %v745_v47 = vmul.f32 %v1530_v12, %v708_v36  ;;  %v526_v48 = vmul.f32 1.0012, %v490_v38  ;;  %v709_v49 = vsub.f32 %v1528_v11, %v381_v25  ;;  %v422_v34 = vld [vmem:[%s1515_s6 + $0xd0] sm:$0xff] }
  0xd7   : > { %815 = vst [vmem:[%s1564_s9 + $0x90] sm:$0xff] %v779_v42  ;;  %v780_v53 = vsub.f32 %v670_v43, %v744_v33  ;;  %v636_v54 = vmul.f32 %v1523_v7, %v599_v45  ;;  %v455_v55 = vmul.f32 %v1518_v3, %v418_v41  ;;  %v491_v56 = vsub.f32 %v346_v39, %v382_v40  ;;  %v386_v33 = vld [vmem:[%s1506_s17 + $0xd0] sm:$0xff]  ;;  %v351_v43 = vld [vmem:[%s1498_s19 + $0xd8] sm:$0xff] }
  0xd8   : > { %v671_v57 = vsub.f32 %v561_v46, %v635_v44  ;;  %v562_v58 = vsub.f32 %v454_v37, %v526_v48  ;;  %v746_v59 = vmul.f32 %v1530_v12, %v709_v49  ;;  %v600_v60 = vsub.f32 %v382_v40, %v1521_v6  ;;  %v387_v44 = vld [vmem:[%s1506_s17 + $0xd8] sm:$0xff] }
  0xd9   : > { %816 = vst [vmem:[%s1564_s9 + $0x98] sm:$0xff] %v780_v53  ;;  %v527_v61 = vmul.f32 1.0012, %v491_v56  ;;  %v710_v62 = vsub.f32 %v1528_v11, %v382_v40  ;;  %v456_v63 = vmul.f32 %v1518_v3, %v419_v52  ;;  %v492_v0 = vsub.f32 %v347_v50, %v383_v51  ;;  %v423_v45 = vld [vmem:[%s1515_s6 + $0xd8] sm:$0xff] }
  0xda   : > { %v781_v5 = vsub.f32 %v671_v57, %v745_v47  ;;  %v672_v8 = vsub.f32 %v562_v58, %v636_v54  ;;  %v637_v9 = vmul.f32 %v1523_v7, %v600_v60  ;;  %v601_v10 = vsub.f32 %v383_v51, %v1521_v6  ;;  %v352_v58 = vld [vmem:[%s1498_s19 + $0xe0] sm:$0xff] }
  0xdb   : > { %v563_v13 = vsub.f32 %v455_v55, %v527_v61  ;;  %v747_v14 = vmul.f32 %v1530_v12, %v710_v62  ;;  %v528_v15 = vmul.f32 1.0012, %v492_v0  ;;  %v711_v16 = vsub.f32 %v1528_v11, %v383_v51  ;;  %v424_v60 = vld [vmem:[%s1515_s6 + $0xe0] sm:$0xff] }
  0xdc   : > { %817 = vst [vmem:[%s1564_s9 + $0xa0] sm:$0xff] %v781_v5  ;;  %v782_v20 = vsub.f32 %v672_v8, %v746_v59  ;;  %v638_v21 = vmul.f32 %v1523_v7, %v601_v10  ;;  %v457_v22 = vmul.f32 %v1518_v3, %v420_v4  ;;  %v493_v23 = vsub.f32 %v348_v1, %v384_v2  ;;  %v388_v59 = vld [vmem:[%s1506_s17 + $0xe0] sm:$0xff]  ;;  %v353_v8 = vld [vmem:[%s1498_s19 + $0xe8] sm:$0xff] }
  0xdd   : > { %v673_v24 = vsub.f32 %v563_v13, %v637_v9  ;;  %v564_v25 = vsub.f32 %v456_v63, %v528_v15  ;;  %v748_v26 = vmul.f32 %v1530_v12, %v711_v16  ;;  %v602_v27 = vsub.f32 %v384_v2, %v1521_v6  ;;  %v389_v9 = vld [vmem:[%s1506_s17 + $0xe8] sm:$0xff] }
  0xde   : > { %818 = vst [vmem:[%s1564_s9 + $0xa8] sm:$0xff] %v782_v20  ;;  %v529_v28 = vmul.f32 1.0012, %v493_v23  ;;  %v712_v29 = vsub.f32 %v1528_v11, %v384_v2  ;;  %v458_v30 = vmul.f32 %v1518_v3, %v421_v19  ;;  %v494_v31 = vsub.f32 %v349_v17, %v385_v18  ;;  %v425_v10 = vld [vmem:[%s1515_s6 + $0xe8] sm:$0xff] }
  0xdf   : > { %v783_v35 = vsub.f32 %v673_v24, %v747_v14  ;;  %v674_v36 = vsub.f32 %v564_v25, %v638_v21  ;;  %v639_v37 = vmul.f32 %v1523_v7, %v602_v27  ;;  %v603_v38 = vsub.f32 %v385_v18, %v1521_v6  ;;  %v354_v25 = vld [vmem:[%s1498_s19 + $0xf0] sm:$0xff] }
  0xe0   : > { %v565_v39 = vsub.f32 %v457_v22, %v529_v28  ;;  %v749_v40 = vmul.f32 %v1530_v12, %v712_v29  ;;  %v530_v41 = vmul.f32 1.0012, %v494_v31  ;;  %v713_v42 = vsub.f32 %v1528_v11, %v385_v18  ;;  %v426_v27 = vld [vmem:[%s1515_s6 + $0xf0] sm:$0xff] }
  0xe1   : > { %819 = vst [vmem:[%s1564_s9 + $0xb0] sm:$0xff] %v783_v35  ;;  %v784_v46 = vsub.f32 %v674_v36, %v748_v26  ;;  %v640_v47 = vmul.f32 %v1523_v7, %v603_v38  ;;  %v459_v48 = vmul.f32 %v1518_v3, %v422_v34  ;;  %v495_v49 = vsub.f32 %v350_v32, %v386_v33  ;;  %v390_v26 = vld [vmem:[%s1506_s17 + $0xf0] sm:$0xff]  ;;  %v355_v36 = vld [vmem:[%s1498_s19 + $0xf8] sm:$0xff] }
  0xe2   : > { %v675_v50 = vsub.f32 %v565_v39, %v639_v37  ;;  %v566_v51 = vsub.f32 %v458_v30, %v530_v41  ;;  %v750_v52 = vmul.f32 %v1530_v12, %v713_v42  ;;  %v604_v53 = vsub.f32 %v386_v33, %v1521_v6  ;;  %v391_v37 = vld [vmem:[%s1506_s17 + $0xf8] sm:$0xff] }
  0xe3   : > { %820 = vst [vmem:[%s1564_s9 + $0xb8] sm:$0xff] %v784_v46  ;;  %v531_v54 = vmul.f32 1.0012, %v495_v49  ;;  %v714_v55 = vsub.f32 %v1528_v11, %v386_v33  ;;  %v460_v56 = vmul.f32 %v1518_v3, %v423_v45  ;;  %v496_v57 = vsub.f32 %v351_v43, %v387_v44  ;;  %v427_v38 = vld [vmem:[%s1515_s6 + $0xf8] sm:$0xff] }
  0xe4   : > { %v785_v61 = vsub.f32 %v675_v50, %v749_v40  ;;  %v676_v62 = vsub.f32 %v566_v51, %v640_v47  ;;  %v641_v63 = vmul.f32 %v1523_v7, %v604_v53  ;;  %v605_v0 = vsub.f32 %v387_v44, %v1521_v6  ;;  %v356_v51 = vld [vmem:[%s1498_s19 + $0x100] sm:$0xff] }
  0xe5   : > { %v567_v1 = vsub.f32 %v459_v48, %v531_v54  ;;  %v751_v2 = vmul.f32 %v1530_v12, %v714_v55  ;;  %v532_v4 = vmul.f32 1.0012, %v496_v57  ;;  %v715_v5 = vsub.f32 %v1528_v11, %v387_v44  ;;  %v428_v53 = vld [vmem:[%s1515_s6 + $0x100] sm:$0xff] }
  0xe6   : > { %821 = vst [vmem:[%s1564_s9 + $0xc0] sm:$0xff] %v785_v61  ;;  %v786_v13 = vsub.f32 %v676_v62, %v750_v52  ;;  %v642_v14 = vmul.f32 %v1523_v7, %v605_v0  ;;  %v461_v15 = vmul.f32 %v1518_v3, %v424_v60  ;;  %v497_v16 = vsub.f32 %v352_v58, %v388_v59  ;;  %v392_v52 = vld [vmem:[%s1506_s17 + $0x100] sm:$0xff]  ;;  %v357_v62 = vld [vmem:[%s1498_s19 + $0x108] sm:$0xff] }
  0xe7   : > { %v677_v17 = vsub.f32 %v567_v1, %v641_v63  ;;  %v568_v18 = vsub.f32 %v460_v56, %v532_v4  ;;  %v752_v19 = vmul.f32 %v1530_v12, %v715_v5  ;;  %v606_v20 = vsub.f32 %v388_v59, %v1521_v6  ;;  %v393_v63 = vld [vmem:[%s1506_s17 + $0x108] sm:$0xff] }
  0xe8   : > { %822 = vst [vmem:[%s1564_s9 + $0xc8] sm:$0xff] %v786_v13  ;;  %v533_v21 = vmul.f32 1.0012, %v497_v16  ;;  %v716_v22 = vsub.f32 %v1528_v11, %v388_v59  ;;  %v462_v23 = vmul.f32 %v1518_v3, %v425_v10  ;;  %v498_v24 = vsub.f32 %v353_v8, %v389_v9  ;;  %v429_v0 = vld [vmem:[%s1515_s6 + $0x108] sm:$0xff] }
  0xe9   : > { %v787_v28 = vsub.f32 %v677_v17, %v751_v2  ;;  %v678_v29 = vsub.f32 %v568_v18, %v642_v14  ;;  %v643_v30 = vmul.f32 %v1523_v7, %v606_v20  ;;  %v607_v31 = vsub.f32 %v389_v9, %v1521_v6  ;;  %v358_v18 = vld [vmem:[%s1498_s19 + $0x110] sm:$0xff] }
  0xea   : > { %v569_v32 = vsub.f32 %v461_v15, %v533_v21  ;;  %v753_v33 = vmul.f32 %v1530_v12, %v716_v22  ;;  %v534_v34 = vmul.f32 1.0012, %v498_v24  ;;  %v717_v35 = vsub.f32 %v1528_v11, %v389_v9  ;;  %v430_v20 = vld [vmem:[%s1515_s6 + $0x110] sm:$0xff] }
  0xeb   : > { %823 = vst [vmem:[%s1564_s9 + $0xd0] sm:$0xff] %v787_v28  ;;  %v788_v39 = vsub.f32 %v678_v29, %v752_v19  ;;  %v644_v40 = vmul.f32 %v1523_v7, %v607_v31  ;;  %v463_v41 = vmul.f32 %v1518_v3, %v426_v27  ;;  %v499_v42 = vsub.f32 %v354_v25, %v390_v26  ;;  %v394_v19 = vld [vmem:[%s1506_s17 + $0x110] sm:$0xff]  ;;  %v359_v29 = vld [vmem:[%s1498_s19 + $0x118] sm:$0xff] }
  0xec   : > { %v679_v43 = vsub.f32 %v569_v32, %v643_v30  ;;  %v570_v44 = vsub.f32 %v462_v23, %v534_v34  ;;  %v754_v45 = vmul.f32 %v1530_v12, %v717_v35  ;;  %v608_v46 = vsub.f32 %v390_v26, %v1521_v6  ;;  %v395_v30 = vld [vmem:[%s1506_s17 + $0x118] sm:$0xff] }
  0xed   : > { %824 = vst [vmem:[%s1564_s9 + $0xd8] sm:$0xff] %v788_v39  ;;  %v535_v47 = vmul.f32 1.0012, %v499_v42  ;;  %v718_v48 = vsub.f32 %v1528_v11, %v390_v26  ;;  %v464_v49 = vmul.f32 %v1518_v3, %v427_v38  ;;  %v500_v50 = vsub.f32 %v355_v36, %v391_v37  ;;  %v431_v31 = vld [vmem:[%s1515_s6 + $0x118] sm:$0xff] }
  0xee   : > { %v789_v54 = vsub.f32 %v679_v43, %v753_v33  ;;  %v680_v55 = vsub.f32 %v570_v44, %v644_v40  ;;  %v645_v56 = vmul.f32 %v1523_v7, %v608_v46  ;;  %v609_v57 = vsub.f32 %v391_v37, %v1521_v6 }
  0xef   : > { %v571_v58 = vsub.f32 %v463_v41, %v535_v47  ;;  %v755_v59 = vmul.f32 %v1530_v12, %v718_v48  ;;  %v536_v60 = vmul.f32 1.0012, %v500_v50  ;;  %v719_v61 = vsub.f32 %v1528_v11, %v391_v37 }
  0xf0   : > { %825 = vst [vmem:[%s1564_s9 + $0xe0] sm:$0xff] %v789_v54  ;;  %v790_v1 = vsub.f32 %v680_v55, %v754_v45  ;;  %v646_v2 = vmul.f32 %v1523_v7, %v609_v57  ;;  %v465_v4 = vmul.f32 %v1518_v3, %v428_v53  ;;  %v501_v5 = vsub.f32 %v356_v51, %v392_v52 }
  0xf1   : > { %v681_v8 = vsub.f32 %v571_v58, %v645_v56  ;;  %v572_v9 = vsub.f32 %v464_v49, %v536_v60  ;;  %v756_v10 = vmul.f32 %v1530_v12, %v719_v61  ;;  %v610_v13 = vsub.f32 %v392_v52, %v1521_v6 }
  0xf2   : > { %826 = vst [vmem:[%s1564_s9 + $0xe8] sm:$0xff] %v790_v1  ;;  %v537_v14 = vmul.f32 1.0012, %v501_v5  ;;  %v720_v15 = vsub.f32 %v1528_v11, %v392_v52  ;;  %v466_v16 = vmul.f32 %v1518_v3, %v429_v0  ;;  %v502_v17 = vsub.f32 %v357_v62, %v393_v63 }
  0xf3   : > { %v791_v21 = vsub.f32 %v681_v8, %v755_v59  ;;  %v682_v22 = vsub.f32 %v572_v9, %v646_v2  ;;  %v647_v23 = vmul.f32 %v1523_v7, %v610_v13  ;;  %v611_v24 = vsub.f32 %v393_v63, %v1521_v6 }
  0xf4   : > { %v573_v25 = vsub.f32 %v465_v4, %v537_v14  ;;  %v757_v26 = vmul.f32 %v1530_v12, %v720_v15  ;;  %v538_v27 = vmul.f32 1.0012, %v502_v17  ;;  %v721_v28 = vsub.f32 %v1528_v11, %v393_v63 }
  0xf5   : > { %827 = vst [vmem:[%s1564_s9 + $0xf0] sm:$0xff] %v791_v21  ;;  %v792_v32 = vsub.f32 %v682_v22, %v756_v10  ;;  %v648_v33 = vmul.f32 %v1523_v7, %v611_v24  ;;  %v467_v34 = vmul.f32 %v1518_v3, %v430_v20  ;;  %v503_v35 = vsub.f32 %v358_v18, %v394_v19 }
  0xf6   : > { %v683_v36 = vsub.f32 %v573_v25, %v647_v23  ;;  %v574_v37 = vsub.f32 %v466_v16, %v538_v27  ;;  %v758_v38 = vmul.f32 %v1530_v12, %v721_v28  ;;  %v612_v39 = vsub.f32 %v394_v19, %v1521_v6 }
  0xf7   : > { %828 = vst [vmem:[%s1564_s9 + $0xf8] sm:$0xff] %v792_v32  ;;  %v539_v40 = vmul.f32 1.0012, %v503_v35  ;;  %v722_v41 = vsub.f32 %v1528_v11, %v394_v19  ;;  %v468_v42 = vmul.f32 %v1518_v3, %v431_v31  ;;  %v504_v43 = vsub.f32 %v359_v29, %v395_v30 }
  0xf8   : > { %v793_v44 = vsub.f32 %v683_v36, %v757_v26  ;;  %v684_v45 = vsub.f32 %v574_v37, %v648_v33  ;;  %v649_v46 = vmul.f32 %v1523_v7, %v612_v39  ;;  %v613_v47 = vsub.f32 %v395_v30, %v1521_v6 }
  0xf9   : > { %v575_v48 = vsub.f32 %v467_v34, %v539_v40  ;;  %v759_v49 = vmul.f32 %v1530_v12, %v722_v41  ;;  %v540_v50 = vmul.f32 1.0012, %v504_v43  ;;  %v723_v51 = vsub.f32 %v1528_v11, %v395_v30 }
  0xfa   : > { %829 = vst [vmem:[%s1564_s9 + $0x100] sm:$0xff] %v793_v44  ;;  %v794_v52 = vsub.f32 %v684_v45, %v758_v38  ;;  %v650_v3 = vmul.f32 %v1523_v7, %v613_v47 }
  0xfb   : > { %v685_v53 = vsub.f32 %v575_v48, %v649_v46  ;;  %v576_v54 = vsub.f32 %v468_v42, %v540_v50  ;;  %v760_v55 = vmul.f32 %v1530_v12, %v723_v51  ;;  %840 = sbr.rel (!%p1923_p9) target bundleno = 286 (0x11e), region = 48 }
  0xfc   : > { %830 = vst [vmem:[%s1564_s9 + $0x108] sm:$0xff] %v794_v52 }
  0xfd   : > { %v795_v56 = vsub.f32 %v685_v53, %v759_v49  ;;  %v686_v57 = vsub.f32 %v576_v54, %v650_v3 }
  0xff   : > { %831 = vst [vmem:[%s1564_s9 + $0x110] sm:$0xff] %v795_v56  ;;  %v796_v6 = vsub.f32 %v686_v57, %v760_v55 }
 0x101   : > { %832 = vst [vmem:[%s1564_s9 + $0x118] sm:$0xff] %v796_v6 }
 0x102   : > { %s1936_s8 = smov (!%p843_p8, %s842_s8), 9 }
 0x103   : > { %s1856_s21 = sshll.u32 %s1936_s8, 9 }
 0x104   : > { %s848_s18 = ssub.s32 4608, %s1856_s21 }
 0x105   : > { %849 = vsyncadd %s834_s13, %s848_s18  ;;  %p1002_p5 = scmp.ne.s32.totalorder %s1856_s21, 0  ;;  %s1024_s10 = smul.u32 4608, %s1318_s0 }
 0x106   : > { %s855_s24 = sshll.u32 %s1564_s9, 4  ;;  %s1257_s16 = smov [#allocation10]   ;;  %s1869_s24 = int_to_ptr.vmem [resolvable:$true] %s855_s24 }
 0x107   : > { %s1867_s15 = scalar_lea.hbm %s1918_s4, %s1024_s10  ;;  %s1173_s17 = scalar_lea.vmem %s1869_s24, %s1856_s21 }
 0x108   : > { %p1174_p0 = scmp.ne.s32.totalorder %s1869_s24, %s1173_s17  ;;  %s1177_s22 = sshll.u32 %s1257_s16, 4  ;;  %s1178_s22 = int_to_ptr.vmem [resolvable:$false] %s1177_s22 }
 0x109   : > { %s1179_s0 = scalar_lea.vmem %s1178_s22, 9216  ;;  %p1180_p11 = scmp.lt.s32.totalorder %s1869_s24, %s1178_s22 }
 0x10a   : > { %p1175_p1 = pnand %p1174_p0, %p1002_p5  ;;  %p1181_p13 = scmp.lt.s32.totalorder %s1179_s0, %s1173_s17 }
 0x10c   : > { %p1176_p3 = pneg %p1175_p1  ;;  %p1182_p4 = por %p1181_p13, %p1180_p11 }
 0x10e   : > { %p1183_p7 = pnand %p1182_p4, %p1176_p3 }
 0x110   : > { %1186 = shalt.err (!%p1183_p7)
}
 0x111   : > { %s1187_s23 = scalar_lea.hbm %s1867_s15, %s1856_s21  ;;  %s1191_s6 = scalar_lea.hbm %s1918_s4, 16896 }
 0x112   : > { %p1188_p10 = scmp.ne.s32.totalorder %s1867_s15, %s1187_s23  ;;  %p1192_p2 = scmp.lt.u32.totalorder %s1867_s15, %s1918_s4 }
 0x113   : > { %p1193_p9 = scmp.lt.u32.totalorder %s1191_s6, %s1187_s23  ;;  %p1195_p0 = scmp.lt.u32.totalorder %s1187_s23, %s1867_s15 }
 0x114   : > { %p1189_p6 = pnand %p1188_p10, %p1002_p5 }
 0x115   : > { %p1194_p8 = por %p1193_p9, %p1192_p2 }
 0x116   : > { %p1190_p12 = pneg %p1189_p6 }
 0x117   : > { %p1196_p1 = por %p1195_p0, %p1194_p8 }
 0x119   : > { %p1197_p3 = pnand %p1196_p1, %p1190_p12 }
 0x11b   : > { %1200 = shalt.err (!%p1197_p3)
}
 0x11c   : > { %s1258_s8 = smov 512   ;;  %s1259_s18 = smov 32  }
 0x11d   : > { %861 = dma.vmem_to_hbm [thread:$0]  (%p1002_p5), %s1869_s24, %s1856_s21, %s1867_s15, %s834_s13, %s1258_s8, %s1258_s8, %s1259_s18  }
 0x11e PF: > { %p1037_p11 = scmp.ge.s32.totalorder %s1245_s28, 2  ;;  %s870_s10 = sand.u32 1, %s1233_s25  }
 0x11f   : > { %p1924_p13 = scmp.ne.s32.totalorder %s1922_s11, 0  ;;  %s871_s19 = scalar_lea.sflag [#allocation6], %s870_s10 }
 0x121   : > { %p1034_p4 = pnand %p1037_p11, %p1924_p13 }
 0x123   : > { %1228 = dma.done.wait (!%p1034_p4), %s871_s19, 4608  }
 0x124   : > { %1230 = vsyncadd (!%p1034_p4), %s871_s19, 4294962688  ;;  %p24_p7 = scmp.ge.s32.totalorder %s1322_s30, 6   ;;  %s1925_s25 = smov %s1237_s26 }
 0x125   : > { %s1926_s26 = smov %s1241_s27  ;;  %s1927_s27 = smov %s1334_s7 }
 0x126   : > { %s1928_s28 = smov %s1322_s30  ;;  %26 = sbr.rel (!%p24_p7) target bundleno = 19 (0x13), region = 101 }
 0x12d   :  { %876 = vsyncpa [#allocation5], 1 }
 0x12e   :  { %878 = vsyncpa [#allocation5 + $0x1], 1 }
 0x12f   :  { %879 = vsyncpa [#allocation8], 1 }
 0x130   :  { %881 = vsyncpa [#allocation8 + $0x1], 1 }
 0x131   :  { %882 = vsyncpa [#allocation6], 1 }
 0x132   :  { %884 = vsyncpa [#allocation6 + $0x1], 1 }

</bundles_post_ra>
